<compile_context>
chip_gen: v6e
topology: v6e:2x2x1
jax: 0.10.0
libtpu: 0.0.40
codegen_flags: <defaults>
</compile_context>

<pallas_src>
import functools

import jax
import jax.numpy as jnp
import numpy as np
from jax import lax
from jax.experimental import pallas as pl
from jax.experimental.pallas import tpu as pltpu


# ----------------------------------------------------------------------------
# Capability probes / small helpers
# ----------------------------------------------------------------------------
@functools.lru_cache(maxsize=None)
def _single_buffer_supported():
    """True iff BlockSpec(pipeline_mode=pl.Buffered(1)) lowers and runs correctly."""
    try:
        def k(a_ref, b_ref, o_ref):
            o_ref[...] = a_ref[...] + b_ref[...]

        n = 4
        a = jnp.arange(n * 8 * 128, dtype=jnp.float32).reshape(n * 8, 128)
        b = jnp.ones((8, 128), jnp.float32)
        out = pl.pallas_call(
            k,
            out_shape=jax.ShapeDtypeStruct((n * 8, 128), jnp.float32),
            grid_spec=pltpu.PrefetchScalarGridSpec(
                num_scalar_prefetch=0,
                grid=(n,),
                in_specs=[
                    pl.BlockSpec((8, 128), lambda i: (i, 0)),
                    pl.BlockSpec((8, 128), lambda i: (0, 0),
                                 pipeline_mode=pl.Buffered(1)),
                ],
                out_specs=pl.BlockSpec((8, 128), lambda i: (i, 0)),
            ),
        )(a, b)
        return bool(jnp.allclose(out, a + 1.0))
    except Exception:
        return False


def _spec(block_shape, index_map, *, single=False):
    """BlockSpec; single-buffered (Buffered(1)) for constant-index blocks if supported."""
    if single and _single_buffer_supported():
        return pl.BlockSpec(block_shape, index_map, pipeline_mode=pl.Buffered(1))
    return pl.BlockSpec(block_shape, index_map)


def _num_tensorcores():
    """Best-effort TensorCores per chip (v7x: 2).  Conservative default: 1."""
    try:
        info = pltpu.get_tpu_info()
        for attr in ("num_cores", "core_count", "num_tensorcores", "tensorcore_count"):
            v = getattr(info, attr, None)
            if isinstance(v, int) and v >= 1:
                return v
    except Exception:
        pass
    try:
        d = jax.devices()[0]
        for attr in ("num_cores", "core_count"):
            v = getattr(d, attr, None)
            if isinstance(v, int) and v >= 1:
                return v
    except Exception:
        pass
    return 1


def _vmem_limit_bytes(estimate):
    try:
        cap = int(pltpu.get_tpu_info().vmem_capacity_bytes)
    except Exception:
        cap = 64 << 20
    return int(min(cap, max(32 << 20, int(estimate * 1.3) + (2 << 20))))


# ----------------------------------------------------------------------------
# Pallas kernels
# ----------------------------------------------------------------------------
def _in_proj_kernel(x_ref, w_ref, b_ref, y_ref):
    """Row/column-tiled input projection: y = x @ W_ih^T + (b_ih + b_hh).

    x_ref: (tm, Din)   w_ref: (Din, tn)   b_ref: (1, tn) f32   y_ref: (tm, tn)
    """
    y_ref[...] = (jnp.dot(x_ref[...], w_ref[...],
                          preferred_element_type=jnp.float32)
                  + b_ref[...]).astype(y_ref.dtype)


def _lstm_block_kernel(xw_ref, whh_ref, h0_ref, c0_ref, *rest,
                       hidden, time_block, fuse_output, t_true, mask_tail):
    """Time-blocked LSTM recurrence.

    Grid = (batch_split [parallel], time_block_index [arbitrary]).
    xw_ref : (TB, Bs, 4H) precomputed x@W_ih + bias (f32 or bf16)
    whh_ref: (H, 4H)      recurrent weights (compute dtype)
    h0/c0  : (Bs, H)      initial state (f32)
    [wout_ref: (H, O_pad) lane-padded output-projection weights, last layer only]
    y_ref  : (TB, Bs, H)  hidden output  OR  (TB, Bs, O_pad) projected output
    hT/cT  : (Bs, H)      final state (written on the last time block)
    h_sc/c_sc: VMEM scratch carrying state across time blocks
    [hbuf  : (TB, Bs, H)  VMEM staging for the fused per-block output projection]
    """
    if fuse_output:
        wout_ref, y_ref, hT_ref, cT_ref, h_sc, c_sc, hbuf = rest
    else:
        y_ref, hT_ref, cT_ref, h_sc, c_sc = rest

    H = hidden
    blk = pl.program_id(1)

    @pl.when(blk == 0)
    def _init():
        h_sc[...] = h0_ref[...]
        c_sc[...] = c0_ref[...]

    w_dtype = whh_ref.dtype
    lane_aligned = (H % 128) == 0

    def step(i, carry):
        h_prev, c_prev = carry
        # Only the recurrent matmul remains inside the serial time chain.  W_hh is read
        # from VMEM per step (not hoisted into the unrolled loop) to avoid vreg spills.
        gates = (xw_ref[i].astype(jnp.float32)
                 + jnp.dot(h_prev.astype(w_dtype), whh_ref[...],
                           preferred_element_type=jnp.float32))
        if lane_aligned:
            # Lane-aligned nonlinearities: only 4H EUP columns per step (i,f | g | o).
            if_part = jax.nn.sigmoid(gates[:, 0:2 * H])
            i_g = if_part[:, 0:H]                 # PyTorch gate order: i, f, g, o
            f_g = if_part[:, H:2 * H]
            g_g = jnp.tanh(gates[:, 2 * H:3 * H])
            o_g = jax.nn.sigmoid(gates[:, 3 * H:4 * H])
        else:
            sig = jax.nn.sigmoid(gates)
            tan = jnp.tanh(gates)
            i_g = sig[:, 0 * H:1 * H]
            f_g = sig[:, 1 * H:2 * H]
            g_g = tan[:, 2 * H:3 * H]
            o_g = sig[:, 3 * H:4 * H]
        c_new = f_g * c_prev + i_g * g_g
        h_new = o_g * jnp.tanh(c_new)
        if mask_tail:
            # T was padded up to a multiple of the time block: freeze the state on
            # padded steps so the carried state / final (h_T, c_T) stay exact.
            valid = (blk * time_block + i) < t_true
            h_new = jnp.where(valid, h_new, h_prev)
            c_new = jnp.where(valid, c_new, c_prev)
        if fuse_output:
            hbuf[i] = h_new
        else:
            y_ref[i] = h_new.astype(y_ref.dtype)
        return (h_new, c_new)

    unroll = time_block if time_block <= 8 else 8   # cap unroll -> bounded live ranges
    h_last, c_last = lax.fori_loop(0, time_block, step,
                                   (h_sc[...], c_sc[...]), unroll=unroll)
    # One scratch store per block (not per step).
    h_sc[...] = h_last
    c_sc[...] = c_last

    if fuse_output:
        # Fused bias-free Linear head: one (TB*Bs, H) x (H, O_pad) matmul per block.
        TB, Bs, _ = hbuf.shape
        h2d = hbuf[...].reshape(TB * Bs, H).astype(wout_ref.dtype)
        proj = jnp.dot(h2d, wout_ref[...], preferred_element_type=jnp.float32)
        y_ref[...] = proj.reshape(TB, Bs, -1).astype(y_ref.dtype)

    @pl.when(blk == pl.num_programs(1) - 1)
    def _final():
        hT_ref[...] = h_sc[...]
        cT_ref[...] = c_sc[...]


# ----------------------------------------------------------------------------
# pallas_call wrappers
# ----------------------------------------------------------------------------
def _run_input_projection(x2d, w_t, b, out_dtype):
    """x2d: (rows, Din)  w_t: (Din, 4H)  b: (1, 4H) f32  ->  (rows, 4H) out_dtype."""
    rows, din = x2d.shape
    G = w_t.shape[-1]

    tm = rows
    for cand in (512, 256, 128, 64, 32, 16, 8):
        if rows >= cand and rows % cand == 0:
            tm = cand
            break

    # N-tile the 4H axis so the weight block is bounded independently of H.
    tn = G
    if G > 2048:
        for cand in (2048, 1024, 512, 256, 128):
            if G % cand == 0:
                tn = cand
                break
    n_m, n_n = rows // tm, G // tn
    w_const = n_n == 1   # weight/bias block index constant over the grid

    est = (2 * tm * din * x2d.dtype.itemsize
           + (1 if w_const else 2) * din * tn * w_t.dtype.itemsize
           + 2 * tn * 4
           + 2 * tm * tn * jnp.dtype(out_dtype).itemsize)

    return pl.pallas_call(
        _in_proj_kernel,
        out_shape=jax.ShapeDtypeStruct((rows, G), out_dtype),
        grid_spec=pltpu.PrefetchScalarGridSpec(
            num_scalar_prefetch=0,
            grid=(n_m, n_n),
            in_specs=[
                pl.BlockSpec((tm, din), lambda i, j: (i, 0)),
                _spec((din, tn), lambda i, j: (0, j), single=w_const),
                _spec((1, tn), lambda i, j: (0, j), single=w_const),
            ],
            out_specs=pl.BlockSpec((tm, tn), lambda i, j: (i, j)),
        ),
        compiler_params=pltpu.CompilerParams(
            dimension_semantics=("parallel", "parallel"),
            vmem_limit_bytes=_vmem_limit_bytes(est)),
    )(x2d, w_t, b)


def _run_lstm_layer(xw_tm, whh_t, h0, c0, *, time_block, t_true, batch_splits=1,
                    w_out_t=None, y_dtype=jnp.float32):
    """xw_tm: (T_pad, B_pad, 4H) precomputed input projection (time-major).
    Returns (y_tm, hT, cT).  If w_out_t is given, y_tm is the projected output
    (T_pad, B_pad, O_pad); otherwise per-step hidden states (T_pad, B_pad, H)."""
    T_pad, B_pad, G = xw_tm.shape
    H = whh_t.shape[0]
    fuse = w_out_t is not None
    O = w_out_t.shape[-1] if fuse else H
    n_blocks = T_pad // time_block
    nb = batch_splits
    Bs = B_pad // nb
    mask_tail = T_pad != t_true
    const_state = nb == 1   # h0/c0 block index constant only without batch split

    in_specs = [
        pl.BlockSpec((time_block, Bs, G), lambda b, t: (t, b, 0)),
        _spec((H, G), lambda b, t: (0, 0), single=True),
        _spec((Bs, H), lambda b, t: (b, 0), single=const_state),
        _spec((Bs, H), lambda b, t: (b, 0), single=const_state),
    ]
    args = [xw_tm, whh_t, h0, c0]
    scratch = [pltpu.VMEM((Bs, H), jnp.float32),
               pltpu.VMEM((Bs, H), jnp.float32)]
    if fuse:
        in_specs.append(_spec((H, O), lambda b, t: (0, 0), single=True))
        args.append(w_out_t)
        scratch.append(pltpu.VMEM((time_block, Bs, H), jnp.float32))

    kernel = functools.partial(_lstm_block_kernel, hidden=H,
                               time_block=time_block, fuse_output=fuse,
                               t_true=t_true, mask_tail=mask_tail)

    out_shape = (jax.ShapeDtypeStruct((T_pad, B_pad, O), y_dtype),
                 jax.ShapeDtypeStruct((B_pad, H), jnp.float32),
                 jax.ShapeDtypeStruct((B_pad, H), jnp.float32))
    out_specs = (pl.BlockSpec((time_block, Bs, O), lambda b, t: (t, b, 0)),
                 pl.BlockSpec((Bs, H), lambda b, t: (b, 0)),
                 pl.BlockSpec((Bs, H), lambda b, t: (b, 0)))

    # Explicit VMEM budget (resident set + margin): weights + xw slab + outputs + scratch.
    xw_b = jnp.dtype(xw_tm.dtype).itemsize
    cd_b = jnp.dtype(whh_t.dtype).itemsize
    y_b = jnp.dtype(y_dtype).itemsize
    est = (2 * time_block * Bs * G * xw_b      # xw slab (double buffered)
           + H * G * cd_b                      # whh
           + 4 * Bs * H * 4                    # h0, c0
           + 2 * time_block * Bs * O * y_b     # y out block
           + 4 * Bs * H * 4                    # hT, cT
           + 2 * Bs * H * 4)                   # h_sc, c_sc
    if fuse:
        est += H * O * cd_b + time_block * Bs * H * 4   # w_out + hbuf

    return pl.pallas_call(
        kernel,
        out_shape=out_shape,
        grid_spec=pltpu.PrefetchScalarGridSpec(
            num_scalar_prefetch=0,
            grid=(nb, n_blocks),
            in_specs=in_specs,
            out_specs=out_specs,
            scratch_shapes=scratch,
        ),
        compiler_params=pltpu.CompilerParams(
            dimension_semantics=("parallel", "arbitrary"),
            vmem_limit_bytes=_vmem_limit_bytes(est)),
    )(*args)


# ----------------------------------------------------------------------------
# Forward pass (mirrors LinearOutputLSTM.forward, eval mode)
# ----------------------------------------------------------------------------
def linear_output_lstm_forward(params, x_pred, hx=None, return_state=False,
                               compute_dtype=jnp.float32, time_block=16,
                               batch_splits=None):
    """params: dict of per-layer LSTM weights (pre-transposed) + output weight.
    x_pred: (B, T, input_dim) batch-first, like PyTorch.
    Returns (B, T, output_dim) [and final (h_n, c_n) if return_state]."""
    B, T, _ = x_pred.shape
    num_layers = len(params["wih_t"])
    H = params["whh_t"][0].shape[0]
    O = params["w_out_t"].shape[-1]
    cd = jnp.dtype(compute_dtype)

    # Sublane-aligned batch padding: 8 rows for f32, 16 for bf16 (packed vregs).
    sub = 16 if cd.itemsize < 4 else 8
    B_pad = max(sub, ((B + sub - 1) // sub) * sub)
    pad_b = B_pad - B

    # Second-TensorCore batch split (v7x): both halves must stay sublane aligned.
    if batch_splits is None:
        batch_splits = _num_tensorcores()
    nb = 2 if (batch_splits >= 2 and B_pad % (2 * sub) == 0) else 1

    # Time blocking: pad T up to a multiple of the block and mask padded steps
    # in-kernel instead of shrinking the block for odd/prime T.
    n_blocks = max(1, -(-T // max(1, time_block)))   # cdiv
    tb = -(-T // n_blocks)                           # cdiv -> minimal padding
    T_pad = n_blocks * tb
    pad_t = T_pad - T

    x_tm = jnp.transpose(x_pred, (1, 0, 2)).astype(jnp.float32)  # (T, B, Din)
    if pad_b or pad_t:
        x_tm = jnp.pad(x_tm, ((0, pad_t), (0, pad_b), (0, 0)))

    if hx is None:
        h0 = jnp.zeros((num_layers, B_pad, H), jnp.float32)
        c0 = jnp.zeros((num_layers, B_pad, H), jnp.float32)
    else:
        h0, c0 = hx
        h0 = jnp.asarray(h0, jnp.float32)
        c0 = jnp.asarray(c0, jnp.float32)
        if pad_b:
            h0 = jnp.pad(h0, ((0, 0), (0, pad_b), (0, 0)))
            c0 = jnp.pad(c0, ((0, 0), (0, pad_b), (0, 0)))

    # Lane-pad the output head to >=128 columns -> lane-dense writeback of the
    # fused projection (O is often tiny, e.g. 8).
    O_pad = max(128, ((O + 127) // 128) * 128)
    w_out_t = params["w_out_t"].astype(cd)
    if O_pad != O:
        w_out_t = jnp.pad(w_out_t, ((0, 0), (0, O_pad - O)))

    # Gate pre-activations stored in compute dtype (bf16 halves the (T,B,4H) HBM
    # round-trip); the in-kernel add and all gate math stay f32.
    xw_dtype = cd if cd.itemsize < 4 else jnp.dtype(jnp.float32)

    layer_in = x_tm
    h_fin, c_fin = [], []
    y_proj = None
    for layer in range(num_layers):
        wih_t = params["wih_t"][layer].astype(cd)
        whh_t = params["whh_t"][layer].astype(cd)
        bias = params["b"][layer].astype(jnp.float32)
        din_l = wih_t.shape[0]

        # Hoisted input projection: one big MXU matmul outside the recurrence.
        xw2d = _run_input_projection(
            layer_in.reshape(T_pad * B_pad, din_l).astype(cd), wih_t, bias,
            out_dtype=xw_dtype)
        xw_tm = xw2d.reshape(T_pad, B_pad, 4 * H)

        last = layer == num_layers - 1
        y_tm, hT, cT = _run_lstm_layer(
            xw_tm, whh_t, h0[layer], c0[layer],
            time_block=tb, t_true=T, batch_splits=nb,
            w_out_t=w_out_t if last else None,
            y_dtype=jnp.float32 if last else cd)
        h_fin.append(hT)
        c_fin.append(cT)
        if last:
            y_proj = y_tm            # (T_pad, B_pad, O_pad) f32, already projected
        else:
            layer_in = y_tm          # (T_pad, B_pad, H) compute dtype
        # TODO(synk): inter-layer dropout (training mode) is not implemented.

    y = jnp.transpose(y_proj[:T, :B, :O], (1, 0, 2))   # (B, T, O)
    if return_state:
        h_n = jnp.stack(h_fin)[:, :B]
        c_n = jnp.stack(c_fin)[:, :B]
        return y, (h_n, c_n)
    return y


# ----------------------------------------------------------------------------
# Deterministic parameter init (mirrors nn.LSTM shapes + xavier_normal_)
# ----------------------------------------------------------------------------
def _xavier_normal(key, shape):
    fan_out, fan_in = shape
    std = float(np.sqrt(2.0 / (fan_in + fan_out)))
    return std * jax.random.normal(key, shape, jnp.float32)


def make_params(key, input_dim, recurrent_dim, num_layers, output_dim):
    H = recurrent_dim
    wih_t, whh_t, biases = [], [], []
    for layer in range(num_layers):
        din = input_dim if layer == 0 else recurrent_dim
        key, k1, k2, k3, k4 = jax.random.split(key, 5)
        w_ih = _xavier_normal(k1, (4 * H, din))          # PyTorch weight_ih_l{k}
        w_hh = _xavier_normal(k2, (4 * H, H))            # PyTorch weight_hh_l{k}
        bound = 1.0 / np.sqrt(H)
        b_ih = jax.random.uniform(k3, (4 * H,), jnp.float32, -bound, bound)
        b_hh = jax.random.uniform(k4, (4 * H,), jnp.float32, -bound, bound)
        wih_t.append(jnp.transpose(w_ih))                # (din, 4H)
        whh_t.append(jnp.transpose(w_hh))                # (H, 4H)
        biases.append((b_ih + b_hh).reshape(1, 4 * H))   # (1, 4H)
    key, ko = jax.random.split(key)
    w_out = _xavier_normal(ko, (output_dim, H))          # nn.Linear(H, O, bias=False)
    return {"wih_t": wih_t, "whh_t": whh_t, "b": biases,
            "w_out_t": jnp.transpose(w_out)}             # (H, O)


# ----------------------------------------------------------------------------
# Pure-JAX reference (full f32 precision) for correctness check
# ----------------------------------------------------------------------------
def reference_forward(params, x_pred, hx=None):
    B, T, _ = x_pred.shape
    num_layers = len(params["wih_t"])
    H = params["whh_t"][0].shape[0]
    hp = jax.lax.Precision.HIGHEST
    x_tm = jnp.transpose(x_pred, (1, 0, 2)).astype(jnp.float32)

    if hx is None:
        h0 = jnp.zeros((num_layers, B, H), jnp.float32)
        c0 = jnp.zeros((num_layers, B, H), jnp.float32)
    else:
        h0, c0 = hx

    h_fin, c_fin = [], []
    for layer in range(num_layers):
        wih_t = params["wih_t"][layer]
        whh_t = params["whh_t"][layer]
        b = params["b"][layer]

        def step(carry, x_t, wih_t=wih_t, whh_t=whh_t, b=b):
            h, c = carry
            gates = (jnp.dot(x_t, wih_t, precision=hp)
                     + jnp.dot(h, whh_t, precision=hp) + b)
            i = jax.nn.sigmoid(gates[:, 0 * H:1 * H])
            f = jax.nn.sigmoid(gates[:, 1 * H:2 * H])
            g = jnp.tanh(gates[:, 2 * H:3 * H])
            o = jax.nn.sigmoid(gates[:, 3 * H:4 * H])
            c = f * c + i * g
            h = o * jnp.tanh(c)
            return (h, c), h

        (hT, cT), y_tm = lax.scan(step, (h0[layer], c0[layer]), x_tm)
        x_tm = y_tm
        h_fin.append(hT)
        c_fin.append(cT)

    y = jnp.dot(x_tm, params["w_out_t"], precision=hp)
    return jnp.transpose(y, (1, 0, 2)), (jnp.stack(h_fin), jnp.stack(c_fin))


# ----------------------------------------------------------------------------
if __name__ == "__main__":
    input_dim, recurrent_dim, num_layers, output_dim = 16, 128, 2, 8

    key = jax.random.PRNGKey(0)
    key_p, key_x, key_x2, key_h, key_c = jax.random.split(key, 5)
    params = make_params(key_p, input_dim, recurrent_dim, num_layers, output_dim)

    # --- Test 1: f32 path, default config, tight check vs pure-JAX reference ---
    B, T = 4, 16
    x_pred = jax.random.normal(key_x, (B, T, input_dim), jnp.float32)
    y, (h_n, c_n) = linear_output_lstm_forward(
        params, x_pred, hx=None, return_state=True, compute_dtype=jnp.float32)
    jax.block_until_ready(y)
    assert y.shape == (B, T, output_dim)
    assert h_n.shape == (num_layers, B, recurrent_dim)
    assert c_n.shape == (num_layers, B, recurrent_dim)

    y_ref, (h_ref, c_ref) = reference_forward(params, x_pred)
    err1 = max(float(jnp.max(jnp.abs(y - y_ref))),
               float(jnp.max(jnp.abs(h_n - h_ref))),
               float(jnp.max(jnp.abs(c_n - c_ref))))
    assert err1 < 1e-3, f"f32 error too large: {err1}"

    # --- Test 2: provided hx, odd T (time padding + mask), forced batch split ---
    B2, T2 = 16, 19
    x2 = jax.random.normal(key_x2, (B2, T2, input_dim), jnp.float32)
    h0 = 0.1 * jax.random.normal(key_h, (num_layers, B2, recurrent_dim), jnp.float32)
    c0 = 0.1 * jax.random.normal(key_c, (num_layers, B2, recurrent_dim), jnp.float32)
    y2, (h2, c2) = linear_output_lstm_forward(
        params, x2, hx=(h0, c0), return_state=True,
        compute_dtype=jnp.float32, batch_splits=2)
    jax.block_until_ready(y2)
    y2_ref, (h2_ref, c2_ref) = reference_forward(params, x2, hx=(h0, c0))
    err2 = max(float(jnp.max(jnp.abs(y2 - y2_ref))),
               float(jnp.max(jnp.abs(h2 - h2_ref))),
               float(jnp.max(jnp.abs(c2 - c2_ref))))
    assert err2 < 2e-3, f"f32 (batch-split / padded-T) error too large: {err2}"

    # --- Test 3: bf16 weights/activations/xw path (performance config) ---------
    y_bf16 = linear_output_lstm_forward(params, x_pred, compute_dtype=jnp.bfloat16)
    jax.block_until_ready(y_bf16)
    err_bf = float(jnp.max(jnp.abs(y_bf16.astype(jnp.float32) - y_ref)))
    assert err_bf < 2e-1, f"bf16 output error too large: {err_bf}"

    print("KERNEL_OK")
</pallas_src>

<mosaic_0001>
module attributes {stable_mosaic.version = 11 : i64} {
  func.func @k(%arg0: i32, %arg1: memref<8x128xf32, #tpu.memory_space<vmem>>, %arg2: memref<8x128xf32, #tpu.memory_space<vmem>>, %arg3: memref<8x128xf32, #tpu.memory_space<vmem>>) attributes {dimension_semantics = [#tpu.dimension_semantics<arbitrary>], iteration_bounds = array<i64: 4>, scalar_prefetch = 0 : i64, scratch_operands = 0 : i64, tpu.core_type = #tpu.core_type<tc>, window_params = [{transform_indices = @transform_0, window_bounds = array<i64: 8, 128>}, {pipeline_mode = #tpu.pipeline_mode<synchronous>, transform_indices = @transform_1, window_bounds = array<i64: 8, 128>}, {transform_indices = @transform_2, window_bounds = array<i64: 8, 128>}]} {
    %c0 = arith.constant 0 : index
    %c0_0 = arith.constant 0 : index
    %0 = vector.load %arg1[%c0, %c0_0] : memref<8x128xf32, #tpu.memory_space<vmem>>, vector<8x128xf32>
    %c0_1 = arith.constant 0 : index
    %c0_2 = arith.constant 0 : index
    %1 = vector.load %arg2[%c0_1, %c0_2] : memref<8x128xf32, #tpu.memory_space<vmem>>, vector<8x128xf32>
    %2 = arith.addf %0, %1 : vector<8x128xf32>
    %c0_3 = arith.constant 0 : index
    %c0_4 = arith.constant 0 : index
    %3 = vector.load %arg3[%c0_3, %c0_4] : memref<8x128xf32, #tpu.memory_space<vmem>>, vector<8x128xf32>
    tpu.vector_store %arg3[%c0_3, %c0_4], %2 {strides = array<i32>} : memref<8x128xf32, #tpu.memory_space<vmem>>, vector<8x128xf32>,
    return
  }
  func.func @transform_0(%arg0: i32) -> (i32, i32) {
    %c0_i32 = arith.constant 0 : i32
    %c0_i32_0 = arith.constant 0 : i32
    return %arg0, %c0_i32 : i32, i32
  }
  func.func @transform_1(%arg0: i32) -> (i32, i32) {
    %c0_i32 = arith.constant 0 : i32
    %c0_i32_0 = arith.constant 0 : i32
    %c0_i32_1 = arith.constant 0 : i32
    return %c0_i32, %c0_i32_0 : i32, i32
  }
  func.func @transform_2(%arg0: i32) -> (i32, i32) {
    %c0_i32 = arith.constant 0 : i32
    %c0_i32_0 = arith.constant 0 : i32
    return %arg0, %c0_i32 : i32, i32
  }
}

module attributes {stable_mosaic.version = 11 : i64} {
  func.func @_in_proj_kernel(%arg0: i32, %arg1: i32, %arg2: memref<128x16xf32, #tpu.memory_space<vmem>>, %arg3: memref<16x512xf32, #tpu.memory_space<vmem>>, %arg4: memref<1x512xf32, #tpu.memory_space<vmem>>, %arg5: memref<128x512xf32, #tpu.memory_space<vmem>>) attributes {dimension_semantics = [#tpu.dimension_semantics<parallel>, #tpu.dimension_semantics<parallel>], iteration_bounds = array<i64: 1, 1>, scalar_prefetch = 0 : i64, scratch_operands = 0 : i64, tpu.core_type = #tpu.core_type<tc>, window_params = [{transform_indices = @transform_0, window_bounds = array<i64: 128, 16>}, {transform_indices = @transform_1, window_bounds = array<i64: 16, 512>}, {transform_indices = @transform_2, window_bounds = array<i64: 1, 512>}, {transform_indices = @transform_3, window_bounds = array<i64: 128, 512>}]} {
    %c0 = arith.constant 0 : index
    %c0_0 = arith.constant 0 : index
    %0 = vector.load %arg2[%c0, %c0_0] : memref<128x16xf32, #tpu.memory_space<vmem>>, vector<128x16xf32>
    %c0_1 = arith.constant 0 : index
    %c0_2 = arith.constant 0 : index
    %1 = vector.load %arg3[%c0_1, %c0_2] : memref<16x512xf32, #tpu.memory_space<vmem>>, vector<16x512xf32>
    %cst = arith.constant dense<0.000000e+00> : vector<128x512xf32>
    %2 = tpu.matmul %0, %1, %cst {dimension_numbers = #tpu.dot_dimension_numbers<[1], [0], [0], [1], [0, 0, 1, 1], [], []>} : vector<128x16xf32>, vector<16x512xf32>, vector<128x512xf32> -> vector<128x512xf32>
    %c0_3 = arith.constant 0 : index
    %c0_4 = arith.constant 0 : index
    %3 = vector.load %arg4[%c0_3, %c0_4] : memref<1x512xf32, #tpu.memory_space<vmem>>, vector<1x512xf32>
    %4 = vector.broadcast %3 : vector<1x512xf32> to vector<128x512xf32>
    %5 = arith.addf %2, %4 : vector<128x512xf32>
    %c0_5 = arith.constant 0 : index
    %c0_6 = arith.constant 0 : index
    %6 = vector.load %arg5[%c0_5, %c0_6] : memref<128x512xf32, #tpu.memory_space<vmem>>, vector<128x512xf32>
    tpu.vector_store %arg5[%c0_5, %c0_6], %5 {strides = array<i32>} : memref<128x512xf32, #tpu.memory_space<vmem>>, vector<128x512xf32>,
    return
  }
  func.func @transform_0(%arg0: i32, %arg1: i32) -> (i32, i32) {
    %c0_i32 = arith.constant 0 : i32
    %c0_i32_0 = arith.constant 0 : i32
    return %arg0, %c0_i32 : i32, i32
  }
  func.func @transform_1(%arg0: i32, %arg1: i32) -> (i32, i32) {
    %c0_i32 = arith.constant 0 : i32
    %c0_i32_0 = arith.constant 0 : i32
    return %c0_i32, %arg1 : i32, i32
  }
  func.func @transform_2(%arg0: i32, %arg1: i32) -> (i32, i32) {
    %c0_i32 = arith.constant 0 : i32
    %c0_i32_0 = arith.constant 0 : i32
    return %c0_i32, %arg1 : i32, i32
  }
  func.func @transform_3(%arg0: i32, %arg1: i32) -> (i32, i32) {
    %c0_i32 = arith.constant 0 : i32
    return %arg0, %arg1 : i32, i32
  }
}

</mosaic_0001>

<bundles_post_ra>
// kernel: tpu_custom_call.1
= control target key start
LH: loop header
LB: loop body
LE: loop exit
PB: predicated region body
PF: predicated region fallthrough
CT: control target
= control target key end

     0   :  { %7 = vsyncpa [#allocation3], 0  ;;  %s647_s0 = inlined_call_operand.hbm [shape: f32[32,128], index: 0, kind: input, shape index: {}]   ;;  %s648_s1 = inlined_call_operand.hbm [shape: f32[8,128], index: 1, kind: input, shape index: {}]   ;;  %s649_s2 = inlined_call_operand.hbm [shape: f32[32,128], index: 2, kind: output, shape index: {}]  }
   0x1   :  { %9 = vsyncpa [#allocation3 + $0x1], 0 }
   0x2   :  { %10 = vsyncpa [#allocation6], 0 }
   0x3   :  { %11 = vsyncpa [#allocation4], 0 }
   0x4   :  { %13 = vsyncpa [#allocation4 + $0x1], 0  ;;  %s483_s9 = smov 0   ;;  %s485_s10 = smov 0  }
   0x5   :  { %s487_s11 = smov 0   ;;  %s489_s12 = smov 0  }
   0x6 LB: > { %s504_s13 = sadd.s32 4294967295, %s463_s12   ;;  %s270_s14 = sadd.s32 4294967294, %s463_s12   ;;  %s463_s12 = sphi %s489_s12, %s671_s12   ;;  %s459_s11 = sphi %s487_s11, %s670_s11   ;;  %s455_s10 = sphi %s485_s10, %s669_s10   ;;  %s451_s9 = sphi %s483_s9, %s668_s9  }
   0x7   : > { %p39_p0 = scmp.ne.s32.totalorder %s455_s10, %s451_s9  ;;  %p650_p1 = scmp.eq.s32.totalorder %s504_s13, 0 }
   0x8   : > { %p90_p3 = scmp.eq.s32.totalorder %s270_s14, 3  ;;  %p271_p5 = scmp.ge.s32.totalorder %s463_s12, 1 }
   0x9   : > { %p513_p4 = por %p650_p1, %p39_p0  ;;  %p97_p7 = scmp.lt.s32.totalorder %s463_s12, 5 }
   0xa   : > { %p518_p6 = por %p90_p3, %p39_p0  ;;  %s465_s18 = smov [#allocation5]  }
   0xb   : > { %s654_s15 = scalar_select %p513_p4, 1, 0 }
   0xc   : > { %s655_s16 = scalar_select %p518_p6, 1, 0 }
   0xd   : > { %p523_p8 = pnand %p271_p5, %p97_p7  ;;  %s110_s19 = sshll.u32 %s465_s18, 4  ;;  %s111_s19 = int_to_ptr.vmem [resolvable:$true] %s110_s19 }
   0xe   : > { %s530_s20 = sadd.s32 1, %s463_s12   ;;  %s26_s24 = sadd.s32 1, %s459_s11 }
   0xf   : > { %s656_s17 = scalar_select %p523_p8, 1, 0 }
  0x10   : > { %p292_p9 = pneg %p523_p8  ;;  %s23_s22 = ssub.s32 %s463_s12, %s530_s20 }
  0x11   : > { %p540_p11 = scmp.eq.s32.totalorder %s23_s22, 0  ;;  %p33_p12 = scmp.ne.s32.totalorder %s459_s11, %s455_s10 }
  0x12   : > { %p534_p10 = pnand %p292_p9, %p650_p1  ;;  %s352_s25 = scalar_lea.vmem %s111_s19, 128 }
  0x13   : > { %p353_p0 = scmp.ne.s32.totalorder %s111_s19, %s352_s25  ;;  %p360_p7 = scmp.lt.s32.totalorder %s111_s19, %s111_s19 }
  0x14   : > { %p343_p13 = pneg %p534_p10  ;;  %p361_p2 = scmp.lt.s32.totalorder %s352_s25, %s352_s25 }
  0x16   : > { %p355_p3 = pnand %p353_p0, %p343_p13  ;;  %p362_p9 = por %p361_p2, %p360_p7 }
  0x18   : > { %p356_p5 = pneg %p355_p3 }
  0x1a   : > { %p363_p1 = pnand %p362_p9, %p356_p5 }
  0x1c   : > { %366 = shalt.err (!%p363_p1)
}
  0x1d   : > { %295 = dma.hbm_to_vmem [thread:$0]  (!%p534_p10), %s648_s1, 128, %s111_s19, [#allocation6]  }
  0x1e   : > { %s557_s28 = scalar_select %p540_p11, %s459_s11, %s26_s24  }
  0x1f   : > { %p34_p1 = scmp.eq.s32.totalorder %s463_s12, 0  ;;  %p659_p2 = scmp.eq.s32.totalorder %s504_s13, 3 }
  0x20   : > { %p305_p0 = scmp.lt.s32.totalorder %s463_s12, 4  ;;  %s121_s30 = sand.u32 1, %s459_s11  }
  0x21   : > { %p565_p13 = por %p659_p2, %p33_p12  ;;  %p35_p3 = por %p34_p1, %p33_p12 }
  0x22   : > { %s274_s3 = sshll.u32 %s121_s30, 3  ;;  %s275_s4 = sshll.u32 %s463_s12, 7 }
  0x23   : > { %s660_s29 = scalar_select %p565_p13, 1, 0 }
  0x24   : > { %s578_s7 = scalar_lea.hbm %s647_s0, %s275_s4  ;;  %s125_s8 = scalar_lea.vmem [#allocation2], %s274_s3 }
  0x25   : > { %s132_s14 = sshll.u32 %s125_s8, 4  ;;  %p580_p10 = pnand %p305_p0, %p35_p3  ;;  %s133_s14 = int_to_ptr.vmem [resolvable:$true] %s132_s14 }
  0x26   : > { %s122_s19 = scalar_lea.sflag [#allocation3], %s121_s30  ;;  %s367_s21 = scalar_lea.hbm %s578_s7, 128 }
  0x27   : > { %p368_p11 = scmp.ne.s32.totalorder %s578_s7, %s367_s21  ;;  %p369_p12 = pneg %p580_p10 }
  0x28   : > { %s372_s24 = scalar_lea.hbm %s647_s0, 512  ;;  %p373_p9 = scmp.lt.s32.totalorder %s578_s7, %s647_s0 }
  0x29   : > { %p370_p5 = pnand %p369_p12, %p368_p11  ;;  %p374_p1 = scmp.lt.s32.totalorder %s372_s24, %s367_s21 }
  0x2b   : > { %p371_p7 = pneg %p370_p5  ;;  %p375_p2 = por %p374_p1, %p373_p9 }
  0x2d   : > { %p376_p0 = pnand %p375_p2, %p371_p7 }
  0x2f   : > { %379 = shalt.err (!%p376_p0)
}
  0x30   : > { %s380_s27 = scalar_lea.vmem %s133_s14, 128  ;;  %s466_s30 = smov [#allocation2]  }
  0x31   : > { %p381_p3 = scmp.ne.s32.totalorder %s133_s14, %s380_s27  ;;  %s385_s3 = sshll.u32 %s466_s30, 4  ;;  %s386_s3 = int_to_ptr.vmem [resolvable:$false] %s385_s3 }
  0x32   : > { %s387_s4 = scalar_lea.vmem %s386_s3, 256  ;;  %p388_p11 = scmp.lt.s32.totalorder %s133_s14, %s386_s3 }
  0x33   : > { %p383_p6 = pnand %p381_p3, %p369_p12  ;;  %p389_p5 = scmp.lt.s32.totalorder %s387_s4, %s380_s27 }
  0x35   : > { %p384_p13 = pneg %p383_p6  ;;  %p390_p4 = por %p389_p5, %p388_p11 }
  0x37   : > { %p391_p8 = pnand %p390_p4, %p384_p13 }
  0x39   : > { %394 = shalt.err (!%p391_p8)
}
  0x3a   : > { %299 = dma.hbm_to_vmem [thread:$0]  (!%p580_p10), %s578_s7, 128, %s133_s14, %s122_s19  }
  0x3b   : > { %p662_p7 = scmp.ne.s32.totalorder %s656_s17, 0 }
  0x3c   : > { %s601_s5 = sand.u32 (!%p662_p7), 1, %s455_s10   ;;  %p663_p6 = scmp.ne.s32.totalorder (!%p662_p7), %s654_s15, 0 }
  0x3d   : > { %141 = sbr.rel (%p662_p7) target bundleno = 95 (0x5f), region = 28  ;;  %s277_s6 = sshll.u32 (!%p662_p7), %s601_s5, 3 }
  0x3e   : > { %s144_s8 = scalar_lea.sflag (!%p662_p7), [#allocation3], %s601_s5  ;;  %s147_s21 = scalar_lea.vmem (!%p662_p7), [#allocation2], %s277_s6 }
  0x42   : > { %438 = dma.done.wait (%p663_p6), %s144_s8, 128  }
  0x43   : > { %440 = vsyncadd (%p663_p6), %s144_s8, 4294967168  ;;  %p664_p4 = scmp.eq.s32.totalorder %s504_s13, 0 }
  0x45   : > { %442 = dma.done.wait (%p664_p4), [#allocation6], 128   ;;  %p665_p8 = pmov %p664_p4 }
  0x46   : > { %s171_s17 = scalar_lea.vmem [#allocation7], %s277_s6  ;;  %s281_s14 = sshll.u32 %s504_s13, 7  ;;  %v172_v0 = vld [vmem:[%s147_s21] sm:$0xff]  ;;  %v173_v1 = vld [vmem:[#allocation5] sm:$0xff] }
  0x47   : > { %444 = vsyncadd (%p665_p8), [#allocation6], 4294967168  ;;  %s190_s7 = sshll.u32 %s171_s17, 4  ;;  %v174_v2 = vadd.f32 %v173_v1, %v172_v0  ;;  %s188_s15 = scalar_lea.hbm %s649_s2, %s281_s14  ;;  %s191_s7 = int_to_ptr.vmem [resolvable:$true] %s190_s7 }
  0x48   : > { %s177_s22 = scalar_lea.sflag [#allocation4], %s601_s5  ;;  %s395_s23 = scalar_lea.vmem %s191_s7, 128 }
  0x49   : > { %175 = vst [vmem:[%s171_s17] sm:$0xff] %v174_v2  ;;  %p396_p13 = scmp.ne.s32.totalorder %s191_s7, %s395_s23  ;;  %p666_p10 = scmp.ne.s32.totalorder %s660_s29, 0 }
  0x4a   : > { %s467_s24 = smov [#allocation7]  }
  0x4b   : > { %p397_p12 = pnand %p396_p13, %p666_p10  ;;  %s399_s25 = sshll.u32 %s467_s24, 4  ;;  %s400_s25 = int_to_ptr.vmem [resolvable:$false] %s399_s25 }
  0x4c   : > { %s401_s26 = scalar_lea.vmem %s400_s25, 256  ;;  %p402_p1 = scmp.lt.s32.totalorder %s191_s7, %s400_s25 }
  0x4d   : > { %p398_p9 = pneg %p397_p12  ;;  %p403_p2 = scmp.lt.s32.totalorder %s401_s26, %s395_s23 }
  0x4f   : > { %p404_p0 = por %p403_p2, %p402_p1 }
  0x51   : > { %p405_p3 = pnand %p404_p0, %p398_p9 }
  0x53   : > { %408 = shalt.err (!%p405_p3)
}
  0x54   : > { %s409_s13 = scalar_lea.hbm %s188_s15, 128  ;;  %s413_s3 = scalar_lea.hbm %s649_s2, 512 }
  0x55   : > { %p410_p11 = scmp.ne.s32.totalorder %s188_s15, %s409_s13  ;;  %p414_p6 = scmp.lt.s32.totalorder %s188_s15, %s649_s2 }
  0x56   : > { %p415_p4 = scmp.lt.s32.totalorder %s413_s3, %s409_s13 }
  0x57   : > { %p411_p5 = pnand %p410_p11, %p666_p10 }
  0x58   : > { %p416_p8 = por %p415_p4, %p414_p6 }
  0x59   : > { %p412_p7 = pneg %p411_p5 }
  0x5b   : > { %p417_p13 = pnand %p416_p8, %p412_p7 }
  0x5d   : > { %420 = shalt.err (!%p417_p13)
}
  0x5e   : > { %290 = dma.vmem_to_hbm [thread:$0]  (%p666_p10), %s191_s7, 128, %s188_s15, %s177_s22  }
  0x5f PF: > { %p307_p12 = scmp.ge.s32.totalorder %s463_s12, 2  ;;  %s202_s6 = sand.u32 1, %s451_s9  }
  0x60   : > { %p667_p9 = scmp.ne.s32.totalorder %s655_s16, 0  ;;  %s203_s8 = scalar_lea.sflag [#allocation4], %s202_s6 }
  0x62   : > { %p301_p1 = pnand %p307_p12, %p667_p9 }
  0x64   : > { %p302_p2 = pneg %p301_p1 }
  0x66   : > { %446 = dma.done.wait (%p302_p2), %s203_s8, 128  }
  0x67   : > { %448 = vsyncadd (%p302_p2), %s203_s8, 4294967168  ;;  %p16_p0 = scmp.ge.s32.totalorder %s530_s20, 6   ;;  %s668_s9 = smov %s455_s10 }
  0x68   : > { %s669_s10 = smov %s459_s11  ;;  %s670_s11 = smov %s557_s28 }
  0x69   : > { %s671_s12 = smov %s530_s20  ;;  %18 = sbr.rel (!%p16_p0) target bundleno = 6 (0x6), region = 77 }
  0x6e   :  { %208 = vsyncpa [#allocation3], 1 }
  0x6f   :  { %210 = vsyncpa [#allocation3 + $0x1], 1 }
  0x70   :  { %211 = vsyncpa [#allocation6], 1 }
  0x71   :  { %212 = vsyncpa [#allocation4], 1 }
  0x72   :  { %214 = vsyncpa [#allocation4 + $0x1], 1 }

// kernel: tpu_custom_call.1
= control target key start
LH: loop header
LB: loop body
LE: loop exit
PB: predicated region body
PF: predicated region fallthrough
CT: control target
= control target key end

     0   :  { %vm61_vm0 = vcmask 130048   ;;  %v570_v9 = vmov 0.0   ;;  %s808_s0 = inlined_call_operand.vmem [shape: f32[128,16], index: 0, kind: input, shape index: {}]   ;;  %s809_s1 = inlined_call_operand.vmem [shape: f32[16,512], index: 1, kind: input, shape index: {}]   ;;  %s810_s2 = inlined_call_operand.vmem [shape: f32[1,512], index: 2, kind: input, shape index: {}]   ;;  %s811_s3 = inlined_call_operand.hbm [shape: f32[128,512], index: 3, kind: output, shape index: {}]  }
   0x1   :  { %v36_v0 = vld [vmem:[%s809_s1 + $0x28] sm:$0xff]  ;;  %v38_v1 = vld [vmem:[%s809_s1 + $0x38] sm:$0xff]  ;;  %v35_v2 = vld [vmem:[%s809_s1 + $0x20] sm:$0xff]  ;;  %174 = vmatprep.mubr.f32.mxu0 %v570_v9  ;;  %335 = vmatprep.mubr.f32.mxu1 %v570_v9 }
   0x2   :  { %138 = vmatprep.subr.mxu0 %v36_v0  ;;  %299 = vmatprep.subr.mxu1 %v38_v1  ;;  %v37_v3 = vld [vmem:[%s809_s1 + $0x30] sm:$0xff]  ;;  %v32_v4 = vld [vmem:[%s809_s1 + $0x8] sm:$0xff]  ;;  %v34_v5 = vld [vmem:[%s809_s1 + $0x18] sm:$0xff] }
   0x3   :  { %139 = vmatpush1.msra.mxu0 %v35_v2  ;;  %300 = vmatpush1.msra.mxu1 %v37_v3  ;;  %v31_v6 = vld [vmem:[%s809_s1] sm:$0xff]  ;;  %v33_v7 = vld [vmem:[%s809_s1 + $0x10] sm:$0xff]  ;;  %v16_v10 = vld [vmem:[%s808_s0 + $0x8] sm:$0xff] }
   0x4   :  { %140 = vmatprep.subr.mxu0 %v32_v4  ;;  %301 = vmatprep.subr.mxu1 %v34_v5  ;;  %v15_v8 = vld [vmem:[%s808_s0] sm:$0xff] }
   0x5   :  { %141 = vmatpush1.msra.mxu0 %v31_v6  ;;  %302 = vmatpush1.msra.mxu1 %v33_v7 }
   0x6   :  { %512 = vmatmul.mubr.msk.f32.vlgmr.msra.gmra.mxu0 %vm61_vm0, %v15_v8  ;;  %528 = vmatmul.mubr.msk.f32.vlgmr.msra.gmra.mxu1 %vm61_vm0, %v15_v8 }
   0x7   :  { %180 = vmatprep.mubr.f32.mxu0 %v570_v9  ;;  %341 = vmatprep.mubr.f32.mxu1 %v570_v9 }
   0x8   :  { %8 = vsyncpa [#allocation3], 0  ;;  %v17_v11 = vld [vmem:[%s808_s0 + $0x10] sm:$0xff]  ;;  %v18_v12 = vld [vmem:[%s808_s0 + $0x18] sm:$0xff]  ;;  %v41_v25 = vlaneseq }
   0x9   :  { %v19_v13 = vld [vmem:[%s808_s0 + $0x20] sm:$0xff]  ;;  %v20_v14 = vld [vmem:[%s808_s0 + $0x28] sm:$0xff]  ;;  %v21_v15 = vld [vmem:[%s808_s0 + $0x30] sm:$0xff] }
   0xa   :  { %513 = vmatmul.mubr.msk.f32.gmra.mxu0 %vm61_vm0, %v16_v10  ;;  %529 = vmatmul.mubr.msk.f32.gmra.mxu1 %vm61_vm0, %v16_v10  ;;  %v22_v16 = vld [vmem:[%s808_s0 + $0x38] sm:$0xff]  ;;  %v23_v17 = vld [vmem:[%s808_s0 + $0x40] sm:$0xff]  ;;  %v24_v18 = vld [vmem:[%s808_s0 + $0x48] sm:$0xff]  ;;  %v42_v26 = vshrl.u32 %v41_v25, 7 }
   0xb   :  { %186 = vmatprep.mubr.f32.mxu0 %v570_v9  ;;  %347 = vmatprep.mubr.f32.mxu1 %v570_v9  ;;  %v25_v19 = vld [vmem:[%s808_s0 + $0x50] sm:$0xff]  ;;  %v26_v20 = vld [vmem:[%s808_s0 + $0x58] sm:$0xff]  ;;  %v27_v21 = vld [vmem:[%s808_s0 + $0x60] sm:$0xff] }
   0xc   :  { %v28_v22 = vld [vmem:[%s808_s0 + $0x68] sm:$0xff]  ;;  %v29_v23 = vld [vmem:[%s808_s0 + $0x70] sm:$0xff]  ;;  %v30_v24 = vld [vmem:[%s808_s0 + $0x78] sm:$0xff]  ;;  %v43_v27 = vsub.s32 0, %v42_v26  ;;  %v51_v28 = vsub.s32 2, %v42_v26  ;;  %v47_v30 = vsub.s32 1, %v42_v26 }
   0xd   :  { %v39_v29 = vld [vmem:[%s810_s2] sm:$0xf]  ;;  %v55_v31 = vsub.s32 3, %v42_v26  ;;  %s571_s0 = smov [#allocation2]  }
   0xe   :  { %514 = vmatmul.mubr.msk.f32.gmra.mxu0 %vm61_vm0, %v17_v11  ;;  %530 = vmatmul.mubr.msk.f32.gmra.mxu1 %vm61_vm0, %v17_v11  ;;  %v733_v32 = vrot.slane %v39_v29, %v43_v27  ;;  %v735_v33 = vrot.slane %v39_v29, %v51_v28  ;;  %v737_v34 = vrot.slane %v39_v29, %v47_v30  ;;  %s501_s2 = sshll.u32 %s571_s0, 4  ;;  %s502_s2 = int_to_ptr.vmem [resolvable:$true] %s501_s2 }
   0xf   :  { %192 = vmatprep.mubr.f32.mxu0 %v570_v9  ;;  %353 = vmatprep.mubr.f32.mxu1 %v570_v9  ;;  %v739_v35 = vrot.slane %v39_v29, %v55_v31  ;;  %s548_s6 = scalar_lea.vmem %s502_s2, 8192  ;;  %p553_p1 = scmp.lt.s32.totalorder %s502_s2, %s502_s2 }
  0x10   :  { %p549_p0 = scmp.ne.s32.totalorder %s502_s2, %s548_s6  ;;  %p554_p2 = scmp.lt.s32.totalorder %s548_s6, %s548_s6 }
  0x12   :  { %515 = vmatmul.mubr.msk.f32.gmra.mxu0 %vm61_vm0, %v18_v12  ;;  %531 = vmatmul.mubr.msk.f32.gmra.mxu1 %vm61_vm0, %v18_v12  ;;  %p555_p3 = por %p554_p2, %p553_p1 }
  0x13   :  { %198 = vmatprep.mubr.f32.mxu0 %v570_v9  ;;  %359 = vmatprep.mubr.f32.mxu1 %v570_v9 }
  0x14   :  { %p556_p4 = pnand %p555_p3, %p549_p0 }
  0x16   :  { %516 = vmatmul.mubr.msk.f32.gmra.mxu0 %vm61_vm0, %v19_v13  ;;  %532 = vmatmul.mubr.msk.f32.gmra.mxu1 %vm61_vm0, %v19_v13 }
  0x17   :  { %204 = vmatprep.mubr.f32.mxu0 %v570_v9  ;;  %365 = vmatprep.mubr.f32.mxu1 %v570_v9 }
  0x1a   :  { %517 = vmatmul.mubr.msk.f32.gmra.mxu0 %vm61_vm0, %v20_v14  ;;  %533 = vmatmul.mubr.msk.f32.gmra.mxu1 %vm61_vm0, %v20_v14 }
  0x1b   :  { %210 = vmatprep.mubr.f32.mxu0 %v570_v9  ;;  %371 = vmatprep.mubr.f32.mxu1 %v570_v9 }
  0x1e   :  { %518 = vmatmul.mubr.msk.f32.gmra.mxu0 %vm61_vm0, %v21_v15  ;;  %534 = vmatmul.mubr.msk.f32.gmra.mxu1 %vm61_vm0, %v21_v15 }
  0x1f   :  { %216 = vmatprep.mubr.f32.mxu0 %v570_v9  ;;  %377 = vmatprep.mubr.f32.mxu1 %v570_v9 }
  0x22   :  { %519 = vmatmul.mubr.msk.f32.gmra.mxu0 %vm61_vm0, %v22_v16  ;;  %535 = vmatmul.mubr.msk.f32.gmra.mxu1 %vm61_vm0, %v22_v16 }
  0x23   :  { %222 = vmatprep.mubr.f32.mxu0 %v570_v9  ;;  %383 = vmatprep.mubr.f32.mxu1 %v570_v9 }
  0x26   :  { %520 = vmatmul.mubr.msk.f32.gmra.mxu0 %vm61_vm0, %v23_v17  ;;  %536 = vmatmul.mubr.msk.f32.gmra.mxu1 %vm61_vm0, %v23_v17 }
  0x27   :  { %228 = vmatprep.mubr.f32.mxu0 %v570_v9  ;;  %389 = vmatprep.mubr.f32.mxu1 %v570_v9 }
  0x2a   :  { %521 = vmatmul.mubr.msk.f32.gmra.mxu0 %vm61_vm0, %v24_v18  ;;  %537 = vmatmul.mubr.msk.f32.gmra.mxu1 %vm61_vm0, %v24_v18 }
  0x2b   :  { %234 = vmatprep.mubr.f32.mxu0 %v570_v9  ;;  %395 = vmatprep.mubr.f32.mxu1 %v570_v9 }
  0x2e   :  { %522 = vmatmul.mubr.msk.f32.gmra.mxu0 %vm61_vm0, %v25_v19  ;;  %538 = vmatmul.mubr.msk.f32.gmra.mxu1 %vm61_vm0, %v25_v19 }
  0x2f   :  { %240 = vmatprep.mubr.f32.mxu0 %v570_v9  ;;  %401 = vmatprep.mubr.f32.mxu1 %v570_v9 }
  0x32   :  { %523 = vmatmul.mubr.msk.f32.gmra.mxu0 %vm61_vm0, %v26_v20  ;;  %539 = vmatmul.mubr.msk.f32.gmra.mxu1 %vm61_vm0, %v26_v20 }
  0x33   :  { %246 = vmatprep.mubr.f32.mxu0 %v570_v9  ;;  %407 = vmatprep.mubr.f32.mxu1 %v570_v9 }
  0x36   :  { %524 = vmatmul.mubr.msk.f32.gmra.mxu0 %vm61_vm0, %v27_v21  ;;  %540 = vmatmul.mubr.msk.f32.gmra.mxu1 %vm61_vm0, %v27_v21 }
  0x37   :  { %252 = vmatprep.mubr.f32.mxu0 %v570_v9  ;;  %413 = vmatprep.mubr.f32.mxu1 %v570_v9 }
  0x3a   :  { %525 = vmatmul.mubr.msk.f32.gmra.mxu0 %vm61_vm0, %v28_v22  ;;  %541 = vmatmul.mubr.msk.f32.gmra.mxu1 %vm61_vm0, %v28_v22 }
  0x3b   :  { %258 = vmatprep.mubr.f32.mxu0 %v570_v9  ;;  %419 = vmatprep.mubr.f32.mxu1 %v570_v9 }
  0x3e   :  { %526 = vmatmul.mubr.msk.f32.gmra.mxu0 %vm61_vm0, %v29_v23  ;;  %542 = vmatmul.mubr.msk.f32.gmra.mxu1 %vm61_vm0, %v29_v23 }
  0x3f   :  { %264 = vmatprep.mubr.f32.mxu0 %v570_v9  ;;  %425 = vmatprep.mubr.f32.mxu1 %v570_v9 }
  0x42   :  { %527 = vmatmul.mubr.msk.f32.gmra.mxu0 %vm61_vm0, %v30_v24  ;;  %543 = vmatmul.mubr.msk.f32.gmra.mxu1 %vm61_vm0, %v30_v24 }
  0xc6   :  { %v176_v36 = vpop.f32.mrf.mxu0  ;;  %v337_v37 = vpop.f32.mrf.mxu1 }
  0xc7   :  { %v177_v38 = vadd.f32 %v176_v36, %v733_v32  ;;  %v338_v39 = vadd.f32 %v337_v37, %v735_v33 }
  0xc8   :  { %v178_v40 = vpop.f32.mrf.mxu0  ;;  %v339_v41 = vpop.f32.mrf.mxu1 }
  0xc9   :  { %432 = vst [vmem:[#allocation2] sm:$0xff] %v177_v38  ;;  %434 = vst [vmem:[#allocation2 + $0x10] sm:$0xff] %v338_v39  ;;  %v179_v42 = vadd.f32 %v178_v40, %v737_v34  ;;  %v340_v43 = vadd.f32 %v339_v41, %v739_v35 }
  0xca   :  { %v182_v44 = vpop.f32.mrf.mxu0  ;;  %v343_v45 = vpop.f32.mrf.mxu1 }
  0xcb   :  { %433 = vst [vmem:[#allocation2 + $0x8] sm:$0xff] %v179_v42  ;;  %435 = vst [vmem:[#allocation2 + $0x18] sm:$0xff] %v340_v43  ;;  %v183_v46 = vadd.f32 %v182_v44, %v733_v32  ;;  %v344_v47 = vadd.f32 %v343_v45, %v735_v33 }
  0xcc   :  { %v184_v48 = vpop.f32.mrf.mxu0  ;;  %v345_v49 = vpop.f32.mrf.mxu1 }
  0xcd   :  { %436 = vst [vmem:[#allocation2 + $0x20] sm:$0xff] %v183_v46  ;;  %438 = vst [vmem:[#allocation2 + $0x30] sm:$0xff] %v344_v47  ;;  %v185_v50 = vadd.f32 %v184_v48, %v737_v34  ;;  %v346_v51 = vadd.f32 %v345_v49, %v739_v35 }
  0xce   :  { %v188_v52 = vpop.f32.mrf.mxu0  ;;  %v349_v53 = vpop.f32.mrf.mxu1 }
  0xcf   :  { %437 = vst [vmem:[#allocation2 + $0x28] sm:$0xff] %v185_v50  ;;  %439 = vst [vmem:[#allocation2 + $0x38] sm:$0xff] %v346_v51  ;;  %v189_v54 = vadd.f32 %v188_v52, %v733_v32  ;;  %v350_v55 = vadd.f32 %v349_v53, %v735_v33 }
  0xd0   :  { %v190_v56 = vpop.f32.mrf.mxu0  ;;  %v351_v57 = vpop.f32.mrf.mxu1 }
  0xd1   :  { %440 = vst [vmem:[#allocation2 + $0x40] sm:$0xff] %v189_v54  ;;  %442 = vst [vmem:[#allocation2 + $0x50] sm:$0xff] %v350_v55  ;;  %v191_v58 = vadd.f32 %v190_v56, %v737_v34  ;;  %v352_v59 = vadd.f32 %v351_v57, %v739_v35 }
  0xd2   :  { %v194_v60 = vpop.f32.mrf.mxu0  ;;  %v355_v61 = vpop.f32.mrf.mxu1 }
  0xd3   :  { %441 = vst [vmem:[#allocation2 + $0x48] sm:$0xff] %v191_v58  ;;  %443 = vst [vmem:[#allocation2 + $0x58] sm:$0xff] %v352_v59  ;;  %v195_v62 = vadd.f32 %v194_v60, %v733_v32  ;;  %v356_v63 = vadd.f32 %v355_v61, %v735_v33 }
  0xd4   :  { %v196_v0 = vpop.f32.mrf.mxu0  ;;  %v357_v1 = vpop.f32.mrf.mxu1 }
  0xd5   :  { %444 = vst [vmem:[#allocation2 + $0x60] sm:$0xff] %v195_v62  ;;  %446 = vst [vmem:[#allocation2 + $0x70] sm:$0xff] %v356_v63  ;;  %v197_v2 = vadd.f32 %v196_v0, %v737_v34  ;;  %v358_v3 = vadd.f32 %v357_v1, %v739_v35 }
  0xd6   :  { %v200_v4 = vpop.f32.mrf.mxu0  ;;  %v361_v5 = vpop.f32.mrf.mxu1 }
  0xd7   :  { %445 = vst [vmem:[#allocation2 + $0x68] sm:$0xff] %v197_v2  ;;  %447 = vst [vmem:[#allocation2 + $0x78] sm:$0xff] %v358_v3  ;;  %v201_v6 = vadd.f32 %v200_v4, %v733_v32  ;;  %v362_v7 = vadd.f32 %v361_v5, %v735_v33 }
  0xd8   :  { %v202_v8 = vpop.f32.mrf.mxu0  ;;  %v363_v9 = vpop.f32.mrf.mxu1 }
  0xd9   :  { %448 = vst [vmem:[#allocation2 + $0x80] sm:$0xff] %v201_v6  ;;  %450 = vst [vmem:[#allocation2 + $0x90] sm:$0xff] %v362_v7  ;;  %v203_v10 = vadd.f32 %v202_v8, %v737_v34  ;;  %v364_v11 = vadd.f32 %v363_v9, %v739_v35 }
  0xda   :  { %v206_v12 = vpop.f32.mrf.mxu0  ;;  %v367_v13 = vpop.f32.mrf.mxu1 }
  0xdb   :  { %449 = vst [vmem:[#allocation2 + $0x88] sm:$0xff] %v203_v10  ;;  %451 = vst [vmem:[#allocation2 + $0x98] sm:$0xff] %v364_v11  ;;  %v207_v14 = vadd.f32 %v206_v12, %v733_v32  ;;  %v368_v15 = vadd.f32 %v367_v13, %v735_v33 }
  0xdc   :  { %v208_v16 = vpop.f32.mrf.mxu0  ;;  %v369_v17 = vpop.f32.mrf.mxu1 }
  0xdd   :  { %452 = vst [vmem:[#allocation2 + $0xa0] sm:$0xff] %v207_v14  ;;  %454 = vst [vmem:[#allocation2 + $0xb0] sm:$0xff] %v368_v15  ;;  %v209_v18 = vadd.f32 %v208_v16, %v737_v34  ;;  %v370_v19 = vadd.f32 %v369_v17, %v739_v35 }
  0xde   :  { %v212_v20 = vpop.f32.mrf.mxu0  ;;  %v373_v21 = vpop.f32.mrf.mxu1 }
  0xdf   :  { %453 = vst [vmem:[#allocation2 + $0xa8] sm:$0xff] %v209_v18  ;;  %455 = vst [vmem:[#allocation2 + $0xb8] sm:$0xff] %v370_v19  ;;  %v213_v22 = vadd.f32 %v212_v20, %v733_v32  ;;  %v374_v23 = vadd.f32 %v373_v21, %v735_v33 }
  0xe0   :  { %v214_v24 = vpop.f32.mrf.mxu0  ;;  %v375_v25 = vpop.f32.mrf.mxu1 }
  0xe1   :  { %456 = vst [vmem:[#allocation2 + $0xc0] sm:$0xff] %v213_v22  ;;  %458 = vst [vmem:[#allocation2 + $0xd0] sm:$0xff] %v374_v23  ;;  %v215_v26 = vadd.f32 %v214_v24, %v737_v34  ;;  %v376_v27 = vadd.f32 %v375_v25, %v739_v35 }
  0xe2   :  { %v218_v28 = vpop.f32.mrf.mxu0  ;;  %v379_v29 = vpop.f32.mrf.mxu1 }
  0xe3   :  { %457 = vst [vmem:[#allocation2 + $0xc8] sm:$0xff] %v215_v26  ;;  %459 = vst [vmem:[#allocation2 + $0xd8] sm:$0xff] %v376_v27  ;;  %v219_v30 = vadd.f32 %v218_v28, %v733_v32  ;;  %v380_v31 = vadd.f32 %v379_v29, %v735_v33 }
  0xe4   :  { %v220_v36 = vpop.f32.mrf.mxu0  ;;  %v381_v37 = vpop.f32.mrf.mxu1 }
  0xe5   :  { %460 = vst [vmem:[#allocation2 + $0xe0] sm:$0xff] %v219_v30  ;;  %462 = vst [vmem:[#allocation2 + $0xf0] sm:$0xff] %v380_v31  ;;  %v221_v38 = vadd.f32 %v220_v36, %v737_v34  ;;  %v382_v39 = vadd.f32 %v381_v37, %v739_v35 }
  0xe6   :  { %v224_v40 = vpop.f32.mrf.mxu0  ;;  %v385_v41 = vpop.f32.mrf.mxu1 }
  0xe7   :  { %461 = vst [vmem:[#allocation2 + $0xe8] sm:$0xff] %v221_v38  ;;  %463 = vst [vmem:[#allocation2 + $0xf8] sm:$0xff] %v382_v39  ;;  %v225_v42 = vadd.f32 %v224_v40, %v733_v32  ;;  %v386_v43 = vadd.f32 %v385_v41, %v735_v33 }
  0xe8   :  { %v226_v44 = vpop.f32.mrf.mxu0  ;;  %v387_v45 = vpop.f32.mrf.mxu1 }
  0xe9   :  { %464 = vst [vmem:[#allocation2 + $0x100] sm:$0xff] %v225_v42  ;;  %466 = vst [vmem:[#allocation2 + $0x110] sm:$0xff] %v386_v43  ;;  %v227_v46 = vadd.f32 %v226_v44, %v737_v34  ;;  %v388_v47 = vadd.f32 %v387_v45, %v739_v35 }
  0xea   :  { %v230_v48 = vpop.f32.mrf.mxu0  ;;  %v391_v49 = vpop.f32.mrf.mxu1 }
  0xeb   :  { %465 = vst [vmem:[#allocation2 + $0x108] sm:$0xff] %v227_v46  ;;  %467 = vst [vmem:[#allocation2 + $0x118] sm:$0xff] %v388_v47  ;;  %v231_v50 = vadd.f32 %v230_v48, %v733_v32  ;;  %v392_v51 = vadd.f32 %v391_v49, %v735_v33 }
  0xec   :  { %v232_v52 = vpop.f32.mrf.mxu0  ;;  %v393_v53 = vpop.f32.mrf.mxu1 }
  0xed   :  { %468 = vst [vmem:[#allocation2 + $0x120] sm:$0xff] %v231_v50  ;;  %470 = vst [vmem:[#allocation2 + $0x130] sm:$0xff] %v392_v51  ;;  %v233_v54 = vadd.f32 %v232_v52, %v737_v34  ;;  %v394_v55 = vadd.f32 %v393_v53, %v739_v35 }
  0xee   :  { %v236_v56 = vpop.f32.mrf.mxu0  ;;  %v397_v57 = vpop.f32.mrf.mxu1 }
  0xef   :  { %469 = vst [vmem:[#allocation2 + $0x128] sm:$0xff] %v233_v54  ;;  %471 = vst [vmem:[#allocation2 + $0x138] sm:$0xff] %v394_v55  ;;  %v237_v58 = vadd.f32 %v236_v56, %v733_v32  ;;  %v398_v59 = vadd.f32 %v397_v57, %v735_v33 }
  0xf0   :  { %v238_v60 = vpop.f32.mrf.mxu0  ;;  %v399_v61 = vpop.f32.mrf.mxu1 }
  0xf1   :  { %472 = vst [vmem:[#allocation2 + $0x140] sm:$0xff] %v237_v58  ;;  %474 = vst [vmem:[#allocation2 + $0x150] sm:$0xff] %v398_v59  ;;  %v239_v62 = vadd.f32 %v238_v60, %v737_v34  ;;  %v400_v63 = vadd.f32 %v399_v61, %v739_v35 }
  0xf2   :  { %v242_v0 = vpop.f32.mrf.mxu0  ;;  %v403_v1 = vpop.f32.mrf.mxu1 }
  0xf3   :  { %473 = vst [vmem:[#allocation2 + $0x148] sm:$0xff] %v239_v62  ;;  %475 = vst [vmem:[#allocation2 + $0x158] sm:$0xff] %v400_v63  ;;  %v243_v2 = vadd.f32 %v242_v0, %v733_v32  ;;  %v404_v3 = vadd.f32 %v403_v1, %v735_v33 }
  0xf4   :  { %v244_v4 = vpop.f32.mrf.mxu0  ;;  %v405_v5 = vpop.f32.mrf.mxu1 }
  0xf5   :  { %476 = vst [vmem:[#allocation2 + $0x160] sm:$0xff] %v243_v2  ;;  %478 = vst [vmem:[#allocation2 + $0x170] sm:$0xff] %v404_v3  ;;  %v245_v6 = vadd.f32 %v244_v4, %v737_v34  ;;  %v406_v7 = vadd.f32 %v405_v5, %v739_v35 }
  0xf6   :  { %v248_v8 = vpop.f32.mrf.mxu0  ;;  %v409_v9 = vpop.f32.mrf.mxu1 }
  0xf7   :  { %477 = vst [vmem:[#allocation2 + $0x168] sm:$0xff] %v245_v6  ;;  %479 = vst [vmem:[#allocation2 + $0x178] sm:$0xff] %v406_v7  ;;  %v249_v10 = vadd.f32 %v248_v8, %v733_v32  ;;  %v410_v11 = vadd.f32 %v409_v9, %v735_v33 }
  0xf8   :  { %v250_v12 = vpop.f32.mrf.mxu0  ;;  %v411_v13 = vpop.f32.mrf.mxu1 }
  0xf9   :  { %480 = vst [vmem:[#allocation2 + $0x180] sm:$0xff] %v249_v10  ;;  %482 = vst [vmem:[#allocation2 + $0x190] sm:$0xff] %v410_v11  ;;  %v251_v14 = vadd.f32 %v250_v12, %v737_v34  ;;  %v412_v15 = vadd.f32 %v411_v13, %v739_v35 }
  0xfa   :  { %v254_v16 = vpop.f32.mrf.mxu0  ;;  %v415_v17 = vpop.f32.mrf.mxu1 }
  0xfb   :  { %481 = vst [vmem:[#allocation2 + $0x188] sm:$0xff] %v251_v14  ;;  %483 = vst [vmem:[#allocation2 + $0x198] sm:$0xff] %v412_v15  ;;  %v255_v18 = vadd.f32 %v254_v16, %v733_v32  ;;  %v416_v19 = vadd.f32 %v415_v17, %v735_v33 }
  0xfc   :  { %v256_v20 = vpop.f32.mrf.mxu0  ;;  %v417_v21 = vpop.f32.mrf.mxu1 }
  0xfd   :  { %484 = vst [vmem:[#allocation2 + $0x1a0] sm:$0xff] %v255_v18  ;;  %486 = vst [vmem:[#allocation2 + $0x1b0] sm:$0xff] %v416_v19  ;;  %v257_v22 = vadd.f32 %v256_v20, %v737_v34  ;;  %v418_v23 = vadd.f32 %v417_v21, %v739_v35 }
  0xfe   :  { %v260_v24 = vpop.f32.mrf.mxu0  ;;  %v421_v25 = vpop.f32.mrf.mxu1 }
  0xff   :  { %485 = vst [vmem:[#allocation2 + $0x1a8] sm:$0xff] %v257_v22  ;;  %487 = vst [vmem:[#allocation2 + $0x1b8] sm:$0xff] %v418_v23  ;;  %v261_v26 = vadd.f32 %v260_v24, %v733_v32  ;;  %v422_v27 = vadd.f32 %v421_v25, %v735_v33 }
 0x100   :  { %v262_v28 = vpop.f32.mrf.mxu0  ;;  %v423_v29 = vpop.f32.mrf.mxu1 }
 0x101   :  { %488 = vst [vmem:[#allocation2 + $0x1c0] sm:$0xff] %v261_v26  ;;  %490 = vst [vmem:[#allocation2 + $0x1d0] sm:$0xff] %v422_v27  ;;  %v263_v30 = vadd.f32 %v262_v28, %v737_v34  ;;  %v424_v31 = vadd.f32 %v423_v29, %v739_v35 }
 0x102   :  { %v266_v36 = vpop.f32.mrf.mxu0  ;;  %v427_v37 = vpop.f32.mrf.mxu1 }
 0x103   :  { %489 = vst [vmem:[#allocation2 + $0x1c8] sm:$0xff] %v263_v30  ;;  %491 = vst [vmem:[#allocation2 + $0x1d8] sm:$0xff] %v424_v31  ;;  %v267_v38 = vadd.f32 %v266_v36, %v733_v32  ;;  %v428_v39 = vadd.f32 %v427_v37, %v735_v33 }
 0x104   :  { %v268_v40 = vpop.f32.mrf.mxu0  ;;  %v429_v41 = vpop.f32.mrf.mxu1 }
 0x105   :  { %492 = vst [vmem:[#allocation2 + $0x1e0] sm:$0xff] %v267_v38  ;;  %494 = vst [vmem:[#allocation2 + $0x1f0] sm:$0xff] %v428_v39  ;;  %v269_v42 = vadd.f32 %v268_v40, %v737_v34  ;;  %v430_v43 = vadd.f32 %v429_v41, %v739_v35 }
 0x107   :  { %493 = vst [vmem:[#allocation2 + $0x1e8] sm:$0xff] %v269_v42  ;;  %495 = vst [vmem:[#allocation2 + $0x1f8] sm:$0xff] %v430_v43 }
 0x108   :  { %559 = shalt.err (!%p556_p4)
}
 0x109   :  { %s572_s7 = smov 512   ;;  %s573_s8 = smov 32  }
 0x10a   :  { %507 = dma.vmem_to_hbm [thread:$0]  %s502_s2, 8192, %s811_s3, [#allocation3], %s572_s7, %s572_s7, %s573_s8  }
 0x10b   :  { %568 = dma.done.wait [#allocation3], 8192  }
 0x10c   :  { %569 = vsyncadd [#allocation3], 4294959104 }
 0x10d   :  { %511 = vsyncpa [#allocation3], 1 }

</bundles_post_ra>
